<compile_context>
chip_gen: v6e
topology: v6e:2x2x1
jax: 0.10.0
libtpu: 0.0.40
codegen_flags: <defaults>
</compile_context>

<pallas_src>
import functools

import jax
import jax.numpy as jnp
from jax.experimental import pallas as pl
from jax.experimental.pallas import tpu as pltpu

ALPHA = 1.0
GAMMA = 2.0
MiB = 1024 * 1024


def _round_up(x, m):
    return ((x + m - 1) // m) * m


def _vmem_capacity_bytes():
    """Per-core VMEM capacity; conservative (v7x-sized) fallback if unknown."""
    try:
        cap = getattr(pltpu.get_tpu_info(), "vmem_capacity_bytes", None)
        if cap:
            return int(cap)
    except Exception:
        pass
    return 64 * MiB


def _pick_tile_n(n, c, itemsize, target_bytes):
    # Size the batch tile so one tile of logits (native dtype) is ~target_bytes.
    rows = max(16, target_bytes // max(1, c * itemsize))
    rows = max(16, (rows // 16) * 16)          # multiple of 16: safe sublanes for f32 and bf16
    rows = min(rows, _round_up(n, 16))         # never tile far beyond the batch
    return max(16, rows)


def _focal_loss_kernel(logits_ref, targets_ref, out_ref, *,
                       alpha, gamma, rows_last, tile_n):
    x = logits_ref[...].astype(jnp.float32)    # (T, C) upcast on the VPU (free vs DMA)
    t = targets_ref[...]                       # (T, 1) int32
    tn, c = x.shape

    # Numerically stable log-softmax cross entropy, reusing (x - m) for the
    # target-logit select:  ce = log(sum exp(x-m)) - sum(where(cls==t, x-m, 0)).
    m = jnp.max(x, axis=-1, keepdims=True)                                 # (T, 1)
    xm = x - m                                                             # (T, C)
    sumexp = jnp.sum(jnp.exp(xm), axis=-1, keepdims=True)                  # (T, 1)

    class_idx = jax.lax.broadcasted_iota(jnp.int32, (tn, c), 1)
    # NOTE: out-of-range target indices silently give tgt_xm = 0 (loss = lse),
    # unlike torch.cross_entropy which raises; inputs are assumed trusted.
    tgt_xm = jnp.sum(jnp.where(class_idx == t, xm, 0.0),
                     axis=-1, keepdims=True)                               # (T, 1)

    # Clamp ce >= 0 so pt <= 1 (avoids NaN from pow of a tiny-negative base).
    ce = jnp.maximum(jnp.log(sumexp) - tgt_xm, 0.0)                        # (T, 1)
    pt = jnp.exp(-ce)
    one_minus_pt = 1.0 - pt

    g = float(gamma)
    if g == 2.0:
        mod = jnp.square(one_minus_pt)          # VPU square, no transcendental
    elif g == int(g) and g >= 0.0:
        mod = jnp.ones_like(one_minus_pt)
        for _ in range(int(g)):
            mod = mod * one_minus_pt
    else:
        mod = one_minus_pt ** g                 # general float gamma (base >= 0)

    f_loss = mod * ce                           # (T, 1)
    if float(alpha) != 1.0:
        f_loss = alpha * f_loss

    if rows_last == tile_n:
        # Batch divides evenly: no masking anywhere (static).
        out_ref[...] = jnp.sum(f_loss).reshape(1, 1, 1)
    else:
        i = pl.program_id(0)
        last = pl.num_programs(0) - 1

        @pl.when(i != last)
        def _():
            out_ref[...] = jnp.sum(f_loss).reshape(1, 1, 1)

        @pl.when(i == last)
        def _():
            # Only the ragged final block pays for the row mask; garbage
            # (possibly NaN) rows from the partial DMA are zeroed before the sum.
            row = jax.lax.broadcasted_iota(jnp.int32, (tn, 1), 0)
            masked = jnp.where(row < rows_last, f_loss, 0.0)
            out_ref[...] = jnp.sum(masked).reshape(1, 1, 1)


def focal_loss(logits, targets, *, alpha=ALPHA, gamma=GAMMA, tile_n=None):
    """logits: (N, C) float (f32/bf16), targets: (N,) int -> scalar float32 (mean)."""
    n, c = logits.shape
    itemsize = jnp.dtype(logits.dtype).itemsize

    # Generation-aware tile / VMEM budget.
    vmem_cap = _vmem_capacity_bytes()
    if vmem_cap >= 96 * MiB:                    # v5e / v6e class (128 MiB VMEM)
        target_tile_bytes = 8 * MiB
        vmem_limit = 96 * MiB
    else:                                       # v7x class (64 MiB per-TC VMEM)
        target_tile_bytes = 4 * MiB
        vmem_limit = 48 * MiB
    vmem_limit = int(min(vmem_limit, vmem_cap))

    if tile_n is None:
        tile_n = _pick_tile_n(n, c, itemsize, target_tile_bytes)
    tile_n = max(16, (tile_n // 16) * 16)

    num_tiles = int(pl.cdiv(n, tile_n))
    rows_last = n - (num_tiles - 1) * tile_n    # valid rows in the final block

    # Inputs go to the kernel in their native dtype (bf16 stays bf16 over HBM).
    targets2d = targets.astype(jnp.int32).reshape(n, 1)

    kernel = functools.partial(
        _focal_loss_kernel,
        alpha=float(alpha), gamma=float(gamma),
        rows_last=rows_last, tile_n=tile_n,
    )

    partials = pl.pallas_call(
        kernel,
        out_shape=jax.ShapeDtypeStruct((num_tiles, 1, 1), jnp.float32),
        grid=(num_tiles,),
        in_specs=[
            pl.BlockSpec((tile_n, c), lambda i: (i, 0)),   # logits tile
            pl.BlockSpec((tile_n, 1), lambda i: (i, 0)),   # targets tile
        ],
        out_specs=pl.BlockSpec((1, 1, 1), lambda i: (i, 0, 0)),
        compiler_params=pltpu.CompilerParams(
            dimension_semantics=("parallel",),             # megacore on v7x
            vmem_limit_bytes=vmem_limit,
        ),
        cost_estimate=pl.CostEstimate(
            flops=6 * n * c + 10 * n,
            transcendentals=n * c + 2 * n,
            bytes_accessed=n * c * itemsize + n * 4 + num_tiles * 4,
        ),
    )(logits, targets2d)

    return jnp.sum(partials) / jnp.float32(n)


def focal_loss_ref(logits, targets, *, alpha=ALPHA, gamma=GAMMA):
    x = logits.astype(jnp.float32)
    lse = jax.scipy.special.logsumexp(x, axis=-1)
    tgt = jnp.take_along_axis(x, targets[:, None].astype(jnp.int32), axis=-1)[:, 0]
    ce = lse - tgt
    pt = jnp.exp(-ce)
    return jnp.mean(alpha * (1.0 - pt) ** gamma * ce)


if __name__ == "__main__":
    key = jax.random.PRNGKey(0)
    k1, k2, k3, k4, k5, k6 = jax.random.split(key, 6)

    # Case 1: tiny f32 batch (8 rows in one ragged 16-row block), small C.
    N, C = 8, 16
    logits = jax.random.normal(k1, (N, C), dtype=jnp.float32)
    targets = jax.random.randint(k2, (N,), 0, C, dtype=jnp.int32)
    out = jax.block_until_ready(focal_loss(logits, targets))
    ref = focal_loss_ref(logits, targets)
    assert jnp.allclose(out, ref, atol=1e-5, rtol=1e-5), (out, ref)

    # Case 2: bf16 inputs, multi-tile grid with a ragged final tile
    # (40 rows, tile 16 -> 3 tiles, last tile has 8 valid rows).
    N2, C2 = 40, 16
    logits2 = jax.random.normal(k3, (N2, C2), dtype=jnp.bfloat16)
    targets2 = jax.random.randint(k4, (N2,), 0, C2, dtype=jnp.int32)
    out2 = jax.block_until_ready(focal_loss(logits2, targets2, tile_n=16))
    ref2 = focal_loss_ref(logits2, targets2)
    assert jnp.allclose(out2, ref2, atol=2e-2, rtol=2e-2), (out2, ref2)

    # Case 3: f32, full-lane C=128, 5 tiles with a ragged final tile
    # (300 rows, tile 64 -> last tile has 44 valid rows).
    N3, C3 = 300, 128
    logits3 = jax.random.normal(k5, (N3, C3), dtype=jnp.float32)
    targets3 = jax.random.randint(k6, (N3,), 0, C3, dtype=jnp.int32)
    out3 = jax.block_until_ready(focal_loss(logits3, targets3, tile_n=64))
    ref3 = focal_loss_ref(logits3, targets3)
    assert jnp.allclose(out3, ref3, atol=1e-5, rtol=1e-4), (out3, ref3)

    print("KERNEL_OK")
</pallas_src>

<mosaic_0001>
module attributes {stable_mosaic.version = 11 : i64} {
  func.func @_focal_loss_kernel(%arg0: i32, %arg1: memref<16x16xf32, #tpu.memory_space<vmem>>, %arg2: memref<16x1xi32, #tpu.memory_space<vmem>>, %arg3: memref<1x1x1xf32, #tpu.memory_space<vmem>>) attributes {dimension_semantics = [#tpu.dimension_semantics<parallel>], iteration_bounds = array<i64: 1>, scalar_prefetch = 0 : i64, scratch_operands = 0 : i64, tpu.core_type = #tpu.core_type<tc>, window_params = [{transform_indices = @transform_0, window_bounds = array<i64: 16, 16>}, {transform_indices = @transform_1, window_bounds = array<i64: 16, 1>}, {transform_indices = @transform_2, window_bounds = array<i64: 1, 1, 1>}]} {
    %c0 = arith.constant 0 : index
    %c0_0 = arith.constant 0 : index
    %0 = vector.load %arg1[%c0, %c0_0] : memref<16x16xf32, #tpu.memory_space<vmem>>, vector<16x16xf32>
    %c0_1 = arith.constant 0 : index
    %c0_2 = arith.constant 0 : index
    %1 = vector.load %arg2[%c0_1, %c0_2] : memref<16x1xi32, #tpu.memory_space<vmem>>, vector<16x1xi32>
    %cst = arith.constant dense<0xFF800000> : vector<16xf32>
    %2 = vector.multi_reduction <maximumf>, %0, %cst [1] : vector<16x16xf32> to vector<16xf32>
    %3 = vector.shape_cast %2 : vector<16xf32> to vector<16x1xf32>
    %4 = vector.broadcast %3 : vector<16x1xf32> to vector<16x16xf32>
    %5 = arith.subf %0, %4 : vector<16x16xf32>
    %6 = math.exp %5 : vector<16x16xf32>
    %cst_3 = arith.constant dense<0.000000e+00> : vector<16xf32>
    %7 = vector.multi_reduction <add>, %6, %cst_3 [1] : vector<16x16xf32> to vector<16xf32>
    %8 = vector.shape_cast %7 : vector<16xf32> to vector<16x1xf32>
    %9 = tpu.iota {dimensions = array<i32: 1>} : vector<16x16xi32>
    %10 = vector.broadcast %1 : vector<16x1xi32> to vector<16x16xi32>
    %11 = arith.cmpi eq, %9, %10 : vector<16x16xi32>
    %cst_4 = arith.constant 0.000000e+00 : f32
    %12 = vector.broadcast %cst_4 : f32 to vector<16x16xf32>
    %13 = arith.select %11, %5, %12 : vector<16x16xi1>, vector<16x16xf32>
    %cst_5 = arith.constant dense<0.000000e+00> : vector<16xf32>
    %14 = vector.multi_reduction <add>, %13, %cst_5 [1] : vector<16x16xf32> to vector<16xf32>
    %15 = vector.shape_cast %14 : vector<16xf32> to vector<16x1xf32>
    %16 = math.log %8 : vector<16x1xf32>
    %17 = arith.subf %16, %15 : vector<16x1xf32>
    %cst_6 = arith.constant 0.000000e+00 : f32
    %18 = vector.broadcast %cst_6 : f32 to vector<16x1xf32>
    %19 = arith.maximumf %17, %18 : vector<16x1xf32>
    %cst_7 = arith.constant 0.000000e+00 : f32
    %20 = vector.broadcast %cst_7 : f32 to vector<16x1xf32>
    %21 = arith.subf %20, %19 : vector<16x1xf32>
    %22 = math.exp %21 : vector<16x1xf32>
    %cst_8 = arith.constant 1.000000e+00 : f32
    %23 = vector.broadcast %cst_8 : f32 to vector<16x1xf32>
    %24 = arith.subf %23, %22 : vector<16x1xf32>
    %25 = arith.mulf %24, %24 : vector<16x1xf32>
    %26 = arith.mulf %25, %19 : vector<16x1xf32>
    %c0_i32 = arith.constant 0 : i32
    %27 = arith.cmpi ne, %arg0, %c0_i32 : i32
    %28 = arith.extui %27 : i1 to i32
    %c0_i32_9 = arith.constant 0 : i32
    %29 = arith.cmpi ne, %28, %c0_i32_9 : i32
    scf.if %29 {
      %33 = vector.shape_cast %26 : vector<16x1xf32> to vector<1x16x1xf32>
      %cst_12 = arith.constant dense<0.000000e+00> : vector<1xf32>
      %34 = vector.multi_reduction <add>, %33, %cst_12 [1, 2] : vector<1x16x1xf32> to vector<1xf32>
      %35 = vector.shape_cast %34 : vector<1xf32> to vector<1x1x1xf32>
      %36 = vector.extract %35[0, 0, 0] : f32 from vector<1x1x1xf32>
      %37 = vector.broadcast %36 : f32 to vector<1x1x1xf32>
      %c0_13 = arith.constant 0 : index
      %c0_14 = arith.constant 0 : index
      %c0_15 = arith.constant 0 : index
      %38 = vector.load %arg3[%c0_13, %c0_14, %c0_15] : memref<1x1x1xf32, #tpu.memory_space<vmem>>, vector<1x1x1xf32>
      tpu.vector_store %arg3[%c0_13, %c0_14, %c0_15], %37 {strides = array<i32>} : memref<1x1x1xf32, #tpu.memory_space<vmem>>, vector<1x1x1xf32>,
    } else {
    }
    %c0_i32_10 = arith.constant 0 : i32
    %30 = arith.cmpi eq, %arg0, %c0_i32_10 : i32
    %31 = arith.extui %30 : i1 to i32
    %c0_i32_11 = arith.constant 0 : i32
    %32 = arith.cmpi ne, %31, %c0_i32_11 : i32
    scf.if %32 {
      %33 = tpu.iota {dimensions = array<i32: 0>} : vector<16x1xi32>
      %c8_i32 = arith.constant 8 : i32
      %34 = vector.broadcast %c8_i32 : i32 to vector<16x1xi32>
      %35 = arith.cmpi slt, %33, %34 : vector<16x1xi32>
      %cst_12 = arith.constant 0.000000e+00 : f32
      %36 = vector.broadcast %cst_12 : f32 to vector<16x1xf32>
      %37 = arith.select %35, %26, %36 : vector<16x1xi1>, vector<16x1xf32>
      %38 = vector.shape_cast %37 : vector<16x1xf32> to vector<1x16x1xf32>
      %cst_13 = arith.constant dense<0.000000e+00> : vector<1xf32>
      %39 = vector.multi_reduction <add>, %38, %cst_13 [1, 2] : vector<1x16x1xf32> to vector<1xf32>
      %40 = vector.shape_cast %39 : vector<1xf32> to vector<1x1x1xf32>
      %41 = vector.extract %40[0, 0, 0] : f32 from vector<1x1x1xf32>
      %42 = vector.broadcast %41 : f32 to vector<1x1x1xf32>
      %c0_14 = arith.constant 0 : index
      %c0_15 = arith.constant 0 : index
      %c0_16 = arith.constant 0 : index
      %43 = vector.load %arg3[%c0_14, %c0_15, %c0_16] : memref<1x1x1xf32, #tpu.memory_space<vmem>>, vector<1x1x1xf32>
      tpu.vector_store %arg3[%c0_14, %c0_15, %c0_16], %42 {strides = array<i32>} : memref<1x1x1xf32, #tpu.memory_space<vmem>>, vector<1x1x1xf32>,
    } else {
    }
    return
  }
  func.func @transform_0(%arg0: i32) -> (i32, i32) {
    %c0_i32 = arith.constant 0 : i32
    %c0_i32_0 = arith.constant 0 : i32
    return %arg0, %c0_i32 : i32, i32
  }
  func.func @transform_1(%arg0: i32) -> (i32, i32) {
    %c0_i32 = arith.constant 0 : i32
    %c0_i32_0 = arith.constant 0 : i32
    return %arg0, %c0_i32 : i32, i32
  }
  func.func @transform_2(%arg0: i32) -> (i32, i32, i32) {
    %c0_i32 = arith.constant 0 : i32
    %c0_i32_0 = arith.constant 0 : i32
    %c0_i32_1 = arith.constant 0 : i32
    return %arg0, %c0_i32, %c0_i32_0 : i32, i32, i32
  }
}

</mosaic_0001>

<bundles_post_ra>
// kernel: tpu_custom_call.1
= control target key start
LH: loop header
LB: loop body
LE: loop exit
PB: predicated region body
PF: predicated region fallthrough
CT: control target
= control target key end

     0   :  { %vm16_vm0 = vcmask 130048   ;;  %s196_s0 = inlined_call_operand.vmem [shape: f32[8,16], index: 0, kind: input, shape index: {}]   ;;  %s197_s1 = inlined_call_operand.vmem [shape: s32[8,1], index: 1, kind: input, shape index: {}]   ;;  %s198_s2 = inlined_call_operand.hbm [shape: f32[1,1,1], index: 2, kind: output, shape index: {}]  }
   0x1   :  { %v12_v0 = vld [vmem:[%s196_s0] sm:$0xff] }
   0x2   :  { %7 = vsyncpa [#allocation3], 0  ;;  %v17_v1 = vsel %vm16_vm0, %v12_v0, -inf  ;;  %v167_v2 = vmov 0   ;;  %v14_v3 = vld [vmem:[%s197_s1] sm:$0xff]  ;;  %v35_v7 = vlaneseq  ;;  %vm104_vm2 = vcmask 7168  }
   0x3   :  { %138 = vset.pattern.permute.xlu0 %v167_v2  ;;  %s168_s0 = smov [#allocation2]   ;;  %vm118_vm3 = vcmask 0  }
   0x4   :  { %18 = vmax.xlane.f32.xlu0 %v17_v1  ;;  %v36_v8 = vand.u32 127, %v35_v7  ;;  %s126_s1 = sshll.u32 %s168_s0, 4  ;;  %s127_s1 = int_to_ptr.vmem [resolvable:$true] %s126_s1 }
   0x5   :  { %s145_s14 = scalar_lea.vmem %s127_s1, 16  ;;  %s149_s15 = scalar_lea.vmem %s127_s1, 32 }
   0x6   :  { %p146_p0 = scmp.ne.s32.totalorder %s127_s1, %s145_s14  ;;  %p150_p1 = scmp.lt.s32.totalorder %s127_s1, %s127_s1 }
   0x7   :  { %p151_p2 = scmp.lt.s32.totalorder %s149_s15, %s145_s14 }
   0x9   :  { %p152_p3 = por %p151_p2, %p150_p1 }
   0xb   :  { %p153_p4 = pnand %p152_p3, %p146_p0 }
  0x1a   :  { %38 = vperm.xlu0 %138, %v14_v3  }
  0x8d   :  { %v19_v4 = vpop.xlane.xlu0 %18 }
  0x8e   :  { %v23_v5 = vsub.f32 %v12_v0, %v19_v4 }
  0x90   :  { %v25_v6 = vmul.f32 1.442695, %v23_v5 }
  0x92   :  { %139 = vpow2.f32 %v25_v6 }
  0x95   :  { %v39_v9 = vpop.permute.xlu0 %38 }
  0x96   :  { %vm43_vm1 = vcmp.eq.s32.totalorder %v36_v8, %v39_v9 }
  0x97   :  { %v45_v12 = vsel %vm43_vm1, %v23_v5, 0.0 }
  0x98   :  { %v47_v13 = vsel %vm16_vm0, %v45_v12, 0.0 }
  0x9f   :  { %v140_v10 = vpop.eup %139 }
  0xa0   :  { %v29_v11 = vsel %vm16_vm0, %v140_v10, 0.0 }
  0xa1   :  { %30 = vadd.xlane.f32.xlu1 %v29_v11 }
  0xa5   :  { %48 = vadd.xlane.f32.xlu1 %v47_v13 }
 0x12a   :  { %v31_v14 = vpop.xlane.xlu1 %30 }
 0x12b   :  { %141 = vlog2.f32 %v31_v14 }
 0x12e   :  { %v49_v17 = vpop.xlane.xlu1 %48 }
 0x138   :  { %v142_v15 = vpop.eup %141 }
 0x139   :  { %v54_v16 = vmul.f32 0.6931472, %v142_v15 }
 0x13b   :  { %v57_v18 = vsub.f32 %v54_v16, %v49_v17 }
 0x13d   :  { %v59_v19 = vmax.f32 %v57_v18, 0.0 }
 0x13f   :  { %v61_v20 = vsub.f32 0.0, %v59_v19 }
 0x141   :  { %v63_v21 = vmul.f32 1.442695, %v61_v20 }
 0x143   :  { %143 = vpow2.f32 %v63_v21 }
 0x150   :  { %v144_v22 = vpop.eup %143 }
 0x151   :  { %v67_v23 = vsub.f32 1.0, %v144_v22 }
 0x153   :  { %v69_v24 = vmul.f32 %v67_v23, %v67_v23 }
 0x155   :  { %v71_v25 = vmul.f32 %v69_v24, %v59_v19 }
 0x157   :  { %v105_v26 = vsel %vm104_vm2, %v71_v25, 0.0 }
 0x158   :  { %108 = vadd.xlane.f32.xlu1 %v105_v26 }
 0x1e1   :  { %v109_v27 = vpop.xlane.xlu1 %108 }
 0x1e2   :  { %v110_v28 = vrot.slane %v109_v27, 4 }
 0x1e4   :  { %v111_v29 = vadd.f32 %v110_v28, %v109_v27 }
 0x1e6   :  { %v112_v30 = vrot.slane %v111_v29, 2 }
 0x1e8   :  { %v113_v31 = vadd.f32 %v112_v30, %v111_v29 }
 0x1ea   :  { %v114_v32 = vrot.slane %v113_v31, 1 }
 0x1ec   :  { %v115_v33 = vadd.f32 %v114_v32, %v113_v31 }
 0x1ee   :  { %134 = vpush %v115_v33 }
 0x21f   :  { %s135_s13 = spop %134 }
 0x220   :  { %v117_v34 = vstv %s135_s13 }
 0x221   :  { %119 = vst.msk [vmem:[#allocation2] sm:$0x1] %vm118_vm3, %v117_v34 }
 0x222   :  { %156 = shalt.err (!%p153_p4)
}
 0x223   :  { %129 = dma.vmem_to_hbm [thread:$0]  %s127_s1, 16, %s198_s2, [#allocation3]  }
 0x224   :  { %165 = dma.done.wait [#allocation3], 16  }
 0x225   :  { %166 = vsyncadd [#allocation3], 4294967280 }
 0x226   :  { %133 = vsyncpa [#allocation3], 1 }

</bundles_post_ra>
